<compile_context>
chip_gen: v7x
topology: tpu7x:2x2x1
jax: 0.10.0
libtpu: 0.0.40
codegen_flags: <defaults>
</compile_context>

<pallas_src>
import math

import jax
import jax.numpy as jnp
from jax import lax
from jax.experimental import pallas as pl
from jax.experimental.pallas import tpu as pltpu


def _attention_kernel(hidp_ref, enc_ref, we_ref, v_ref, o_ref):
    """One (batch_block, time_block) grid step.

    hidp_ref : (b_blk, H)         f32  hidden @ Wh^T + bias (precomputed once)
    enc_ref  : (t_blk, b_blk, H)       encoder slab, native [T, B, H] layout
    we_ref   : (H, H)                  attn.weight[:, H:].T  (so x @ we == x @ We^T)
    v_ref    : (1, H)             f32
    o_ref    : (T, b_blk)         f32  resident across the T grid axis: holds raw
                                        scores until the last T step, the softmax
                                        result afterwards.
    """
    j = pl.program_id(1)
    t_blk, b_blk, H = enc_ref.shape

    # Grid-invariant operands: load / broadcast once, outside the T loop.
    we = we_ref[...]
    hidp = hidp_ref[...]
    v_b = jnp.broadcast_to(v_ref[...], (b_blk, H))

    def body(t, carry):
        e_t = enc_ref[t]                                              # (b_blk, H)
        proj = jnp.dot(e_t, we, preferred_element_type=jnp.float32)   # MXU, M=b_blk
        energy = jnp.maximum(proj + hidp, 0.0)                        # VPU
        s_t = jnp.sum(energy * v_b, axis=-1)                          # VPU mul + lane reduce
        o_ref[pl.ds(j * t_blk + t, 1), :] = s_t[None, :]
        return carry

    lax.fori_loop(0, t_blk, body, 0, unroll=True)

    # All T score rows for this batch block are in place -> softmax over T.
    @pl.when(j == pl.num_programs(1) - 1)
    def _():
        score = o_ref[...]                                   # (T, b_blk)
        m = jnp.max(score, axis=0, keepdims=True)
        p = jnp.exp(score - m)
        denom = jnp.sum(p, axis=0, keepdims=True)
        o_ref[...] = p * pl.reciprocal(denom, approx=True)   # EUP reciprocal


def _largest_divisor_leq(n, cap):
    d = max(1, min(n, cap))
    while n % d:
        d -= 1
    return d


def attention_forward(hidden, encoder_outputs, attn_w, attn_b, v,
                      *, b_blk=None, t_blk=None):
    """
    hidden          : [1, B, H]
    encoder_outputs : [T, B, H]   (native layout; NOT transposed by the wrapper)
    attn_w          : [H, 2H]     nn.Linear(2H, H).weight
    attn_b          : [H]
    v               : [H]
    returns         : [B, 1, T]   softmax attention weights over T
    """
    T, B, H = encoder_outputs.shape

    # Hoisted hidden projection: one [B,H] @ [H,H] matmul + bias, done once.
    wh_t = jnp.transpose(attn_w[:, :H]).astype(jnp.float32)                 # Wh^T
    hid_proj = hidden[0].astype(jnp.float32) @ wh_t + attn_b.astype(jnp.float32)

    # Encoder-side weight, pre-transposed; kept in the encoder's dtype so callers
    # can feed bf16 on v6e/v7x (f32 accumulation stays inside the kernel).
    we_t = jnp.transpose(attn_w[:, H:]).astype(encoder_outputs.dtype)       # We^T
    v_row = v.reshape(1, H).astype(jnp.float32)

    # Batch block: full batch, or a multiple-of-128 divisor (keeps both the
    # encoder block's second-minor dim and the output block's lane dim legal
    # under the (8, 128) rules, and lane-dense for large B).
    if b_blk is None:
        b_blk = B
        if B > 512:
            for d in range(512, 127, -128):
                if B % d == 0:
                    b_blk = d
                    break
    # Time block: amortize per-grid-step overhead while keeping ~8 MiB per
    # encoder buffer (x2 double-buffering) -- comfortable on v7x's 64 MiB VMEM.
    if t_blk is None:
        bytes_per_t = b_blk * H * encoder_outputs.dtype.itemsize
        t_blk = _largest_divisor_leq(T, max(1, (8 << 20) // bytes_per_t))
    assert B % b_blk == 0 and T % t_blk == 0, (B, b_blk, T, t_blk)

    grid = (B // b_blk, T // t_blk)

    scores_tb = pl.pallas_call(
        _attention_kernel,
        out_shape=jax.ShapeDtypeStruct((T, B), jnp.float32),
        grid_spec=pltpu.PrefetchScalarGridSpec(
            num_scalar_prefetch=0,
            grid=grid,
            in_specs=[
                pl.BlockSpec((b_blk, H), lambda i, j: (i, 0)),            # hid_proj
                pl.BlockSpec((t_blk, b_blk, H), lambda i, j: (j, i, 0)),  # encoder, native [T,B,H]
                pl.BlockSpec((H, H), lambda i, j: (0, 0)),                # We^T (grid-invariant)
                pl.BlockSpec((1, H), lambda i, j: (0, 0)),                # v    (grid-invariant)
            ],
            out_specs=pl.BlockSpec((T, b_blk), lambda i, j: (0, i)),      # resident over T axis
        ),
        compiler_params=pltpu.CompilerParams(
            dimension_semantics=("parallel", "arbitrary")),
    )(hid_proj, encoder_outputs, we_t, v_row)

    # Tiny score-tensor reshape only: [T, B] -> [B, 1, T].
    return jnp.transpose(scores_tb)[:, None, :]


def _reference(hidden, encoder_outputs, attn_w, attn_b, v):
    """Pure-JAX reference mirroring the PyTorch forward."""
    T, B, H = encoder_outputs.shape
    h = jnp.broadcast_to(hidden, (T, B, H)).transpose(1, 0, 2)    # [B, T, H]
    enc = encoder_outputs.transpose(1, 0, 2)                      # [B, T, H]
    cat = jnp.concatenate([h, enc], axis=2)                       # [B, T, 2H]
    energy = jax.nn.relu(cat @ attn_w.T + attn_b)                 # [B, T, H]
    scores = jnp.einsum('h,bth->bt', v, energy)                   # [B, T]
    return jax.nn.softmax(scores, axis=1)[:, None, :]             # [B, 1, T]


if __name__ == "__main__":
    B, T, H = 2, 8, 32
    key = jax.random.PRNGKey(0)
    k1, k2, k3, k4, k5 = jax.random.split(key, 5)

    # deterministic parameter init (matching PyTorch init schemes)
    k_lin = 1.0 / math.sqrt(2 * H)
    attn_w = jax.random.uniform(k1, (H, 2 * H), jnp.float32, -k_lin, k_lin)  # Linear weight
    attn_b = jax.random.uniform(k2, (H,), jnp.float32, -k_lin, k_lin)        # Linear bias
    v = jax.random.normal(k3, (H,), jnp.float32) * (1.0 / math.sqrt(H))      # v ~ N(0, 1/sqrt(H))

    # example inputs
    hidden = jax.random.normal(k4, (1, B, H), jnp.float32)            # [1, B, H]
    encoder_outputs = jax.random.normal(k5, (T, B, H), jnp.float32)   # [T, B, H]

    # t_blk=4 -> two T-grid steps: exercises the resident-output / pl.when path.
    out = attention_forward(hidden, encoder_outputs, attn_w, attn_b, v, t_blk=4)
    out = jax.block_until_ready(out)

    ref = _reference(hidden, encoder_outputs, attn_w, attn_b, v)
    assert out.shape == (B, 1, T)
    assert jnp.allclose(out, ref, atol=2e-3, rtol=2e-3), (
        f"mismatch vs reference: max abs err {jnp.max(jnp.abs(out - ref)):.3e}")

    print("KERNEL_OK")
</pallas_src>

<mosaic_0001>
module attributes {stable_mosaic.version = 11 : i64} {
  func.func @_attention_kernel(%arg0: i32, %arg1: i32, %arg2: memref<2x32xf32, #tpu.memory_space<vmem>>, %arg3: memref<4x2x32xf32, #tpu.memory_space<vmem>>, %arg4: memref<32x32xf32, #tpu.memory_space<vmem>>, %arg5: memref<1x32xf32, #tpu.memory_space<vmem>>, %arg6: memref<8x2xf32, #tpu.memory_space<vmem>>) attributes {dimension_semantics = [#tpu.dimension_semantics<parallel>, #tpu.dimension_semantics<arbitrary>], iteration_bounds = array<i64: 1, 2>, scalar_prefetch = 0 : i64, scratch_operands = 0 : i64, tpu.core_type = #tpu.core_type<tc>, window_params = [{transform_indices = @transform_0, window_bounds = array<i64: 2, 32>}, {transform_indices = @transform_1, window_bounds = array<i64: 4, 2, 32>}, {pipeline_mode = #tpu.pipeline_mode<synchronous>, transform_indices = @transform_2, window_bounds = array<i64: 32, 32>}, {pipeline_mode = #tpu.pipeline_mode<synchronous>, transform_indices = @transform_3, window_bounds = array<i64: 1, 32>}, {transform_indices = @transform_4, window_bounds = array<i64: 8, 2>}]} {
    %c0 = arith.constant 0 : index
    %c0_0 = arith.constant 0 : index
    %0 = vector.load %arg4[%c0, %c0_0] : memref<32x32xf32, #tpu.memory_space<vmem>>, vector<32x32xf32>
    %c0_1 = arith.constant 0 : index
    %c0_2 = arith.constant 0 : index
    %1 = vector.load %arg2[%c0_1, %c0_2] : memref<2x32xf32, #tpu.memory_space<vmem>>, vector<2x32xf32>
    %c0_3 = arith.constant 0 : index
    %c0_4 = arith.constant 0 : index
    %2 = vector.load %arg5[%c0_3, %c0_4] : memref<1x32xf32, #tpu.memory_space<vmem>>, vector<1x32xf32>
    %3 = vector.shape_cast %2 : vector<1x32xf32> to vector<1x32xf32>
    %4 = vector.broadcast %3 : vector<1x32xf32> to vector<2x32xf32>
    %c0_i32 = arith.constant 0 : i32
    %5 = arith.index_cast %c0_i32 : i32 to index
    %c0_5 = arith.constant 0 : index
    %c0_6 = arith.constant 0 : index
    %6 = vector.load %arg3[%5, %c0_5, %c0_6] : memref<4x2x32xf32, #tpu.memory_space<vmem>>, vector<1x2x32xf32>
    %7 = vector.shape_cast %6 : vector<1x2x32xf32> to vector<2x32xf32>
    %cst = arith.constant dense<0.000000e+00> : vector<2x32xf32>
    %8 = tpu.matmul %7, %0, %cst {dimension_numbers = #tpu.dot_dimension_numbers<[1], [0], [0], [1], [0, 0, 1, 1], [], []>} : vector<2x32xf32>, vector<32x32xf32>, vector<2x32xf32> -> vector<2x32xf32>
    %9 = arith.addf %8, %1 : vector<2x32xf32>
    %cst_7 = arith.constant 0.000000e+00 : f32
    %10 = vector.broadcast %cst_7 : f32 to vector<2x32xf32>
    %11 = arith.maximumf %9, %10 : vector<2x32xf32>
    %12 = arith.mulf %11, %4 : vector<2x32xf32>
    %cst_8 = arith.constant dense<0.000000e+00> : vector<2xf32>
    %13 = vector.multi_reduction <add>, %12, %cst_8 [1] : vector<2x32xf32> to vector<2xf32>
    %14 = vector.shape_cast %13 : vector<2xf32> to vector<1x2xf32>
    %c4_i32 = arith.constant 4 : i32
    %15 = arith.muli %arg1, %c4_i32 : i32
    %16 = arith.addi %15, %c0_i32 : i32
    %17 = arith.index_cast %16 : i32 to index
    %c0_9 = arith.constant 0 : index
    %18 = vector.load %arg6[%17, %c0_9] : memref<8x2xf32, #tpu.memory_space<vmem>>, vector<1x2xf32>
    tpu.vector_store %arg6[%17, %c0_9], %14 {strides = array<i32>} : memref<8x2xf32, #tpu.memory_space<vmem>>, vector<1x2xf32>,
    %c1_i32 = arith.constant 1 : i32
    %19 = arith.index_cast %c1_i32 : i32 to index
    %c0_10 = arith.constant 0 : index
    %c0_11 = arith.constant 0 : index
    %20 = vector.load %arg3[%19, %c0_10, %c0_11] : memref<4x2x32xf32, #tpu.memory_space<vmem>>, vector<1x2x32xf32>
    %21 = vector.shape_cast %20 : vector<1x2x32xf32> to vector<2x32xf32>
    %cst_12 = arith.constant dense<0.000000e+00> : vector<2x32xf32>
    %22 = tpu.matmul %21, %0, %cst_12 {dimension_numbers = #tpu.dot_dimension_numbers<[1], [0], [0], [1], [0, 0, 1, 1], [], []>} : vector<2x32xf32>, vector<32x32xf32>, vector<2x32xf32> -> vector<2x32xf32>
    %23 = arith.addf %22, %1 : vector<2x32xf32>
    %cst_13 = arith.constant 0.000000e+00 : f32
    %24 = vector.broadcast %cst_13 : f32 to vector<2x32xf32>
    %25 = arith.maximumf %23, %24 : vector<2x32xf32>
    %26 = arith.mulf %25, %4 : vector<2x32xf32>
    %cst_14 = arith.constant dense<0.000000e+00> : vector<2xf32>
    %27 = vector.multi_reduction <add>, %26, %cst_14 [1] : vector<2x32xf32> to vector<2xf32>
    %28 = vector.shape_cast %27 : vector<2xf32> to vector<1x2xf32>
    %c4_i32_15 = arith.constant 4 : i32
    %29 = arith.muli %arg1, %c4_i32_15 : i32
    %30 = arith.addi %29, %c1_i32 : i32
    %31 = arith.index_cast %30 : i32 to index
    %c0_16 = arith.constant 0 : index
    %32 = vector.load %arg6[%31, %c0_16] : memref<8x2xf32, #tpu.memory_space<vmem>>, vector<1x2xf32>
    tpu.vector_store %arg6[%31, %c0_16], %28 {strides = array<i32>} : memref<8x2xf32, #tpu.memory_space<vmem>>, vector<1x2xf32>,
    %c2_i32 = arith.constant 2 : i32
    %33 = arith.index_cast %c2_i32 : i32 to index
    %c0_17 = arith.constant 0 : index
    %c0_18 = arith.constant 0 : index
    %34 = vector.load %arg3[%33, %c0_17, %c0_18] : memref<4x2x32xf32, #tpu.memory_space<vmem>>, vector<1x2x32xf32>
    %35 = vector.shape_cast %34 : vector<1x2x32xf32> to vector<2x32xf32>
    %cst_19 = arith.constant dense<0.000000e+00> : vector<2x32xf32>
    %36 = tpu.matmul %35, %0, %cst_19 {dimension_numbers = #tpu.dot_dimension_numbers<[1], [0], [0], [1], [0, 0, 1, 1], [], []>} : vector<2x32xf32>, vector<32x32xf32>, vector<2x32xf32> -> vector<2x32xf32>
    %37 = arith.addf %36, %1 : vector<2x32xf32>
    %cst_20 = arith.constant 0.000000e+00 : f32
    %38 = vector.broadcast %cst_20 : f32 to vector<2x32xf32>
    %39 = arith.maximumf %37, %38 : vector<2x32xf32>
    %40 = arith.mulf %39, %4 : vector<2x32xf32>
    %cst_21 = arith.constant dense<0.000000e+00> : vector<2xf32>
    %41 = vector.multi_reduction <add>, %40, %cst_21 [1] : vector<2x32xf32> to vector<2xf32>
    %42 = vector.shape_cast %41 : vector<2xf32> to vector<1x2xf32>
    %c4_i32_22 = arith.constant 4 : i32
    %43 = arith.muli %arg1, %c4_i32_22 : i32
    %44 = arith.addi %43, %c2_i32 : i32
    %45 = arith.index_cast %44 : i32 to index
    %c0_23 = arith.constant 0 : index
    %46 = vector.load %arg6[%45, %c0_23] : memref<8x2xf32, #tpu.memory_space<vmem>>, vector<1x2xf32>
    tpu.vector_store %arg6[%45, %c0_23], %42 {strides = array<i32>} : memref<8x2xf32, #tpu.memory_space<vmem>>, vector<1x2xf32>,
    %c3_i32 = arith.constant 3 : i32
    %47 = arith.index_cast %c3_i32 : i32 to index
    %c0_24 = arith.constant 0 : index
    %c0_25 = arith.constant 0 : index
    %48 = vector.load %arg3[%47, %c0_24, %c0_25] : memref<4x2x32xf32, #tpu.memory_space<vmem>>, vector<1x2x32xf32>
    %49 = vector.shape_cast %48 : vector<1x2x32xf32> to vector<2x32xf32>
    %cst_26 = arith.constant dense<0.000000e+00> : vector<2x32xf32>
    %50 = tpu.matmul %49, %0, %cst_26 {dimension_numbers = #tpu.dot_dimension_numbers<[1], [0], [0], [1], [0, 0, 1, 1], [], []>} : vector<2x32xf32>, vector<32x32xf32>, vector<2x32xf32> -> vector<2x32xf32>
    %51 = arith.addf %50, %1 : vector<2x32xf32>
    %cst_27 = arith.constant 0.000000e+00 : f32
    %52 = vector.broadcast %cst_27 : f32 to vector<2x32xf32>
    %53 = arith.maximumf %51, %52 : vector<2x32xf32>
    %54 = arith.mulf %53, %4 : vector<2x32xf32>
    %cst_28 = arith.constant dense<0.000000e+00> : vector<2xf32>
    %55 = vector.multi_reduction <add>, %54, %cst_28 [1] : vector<2x32xf32> to vector<2xf32>
    %56 = vector.shape_cast %55 : vector<2xf32> to vector<1x2xf32>
    %c4_i32_29 = arith.constant 4 : i32
    %57 = arith.muli %arg1, %c4_i32_29 : i32
    %58 = arith.addi %57, %c3_i32 : i32
    %59 = arith.index_cast %58 : i32 to index
    %c0_30 = arith.constant 0 : index
    %60 = vector.load %arg6[%59, %c0_30] : memref<8x2xf32, #tpu.memory_space<vmem>>, vector<1x2xf32>
    tpu.vector_store %arg6[%59, %c0_30], %56 {strides = array<i32>} : memref<8x2xf32, #tpu.memory_space<vmem>>, vector<1x2xf32>,
    %c4_i32_31 = arith.constant 4 : i32
    %c1_i32_32 = arith.constant 1 : i32
    %61 = arith.cmpi eq, %arg1, %c1_i32_32 : i32
    %62 = arith.extui %61 : i1 to i32
    %c0_i32_33 = arith.constant 0 : i32
    %63 = arith.cmpi ne, %62, %c0_i32_33 : i32
    scf.if %63 {
      %c0_34 = arith.constant 0 : index
      %c0_35 = arith.constant 0 : index
      %64 = vector.load %arg6[%c0_34, %c0_35] : memref<8x2xf32, #tpu.memory_space<vmem>>, vector<8x2xf32>
      %cst_36 = arith.constant dense<0xFF800000> : vector<2xf32>
      %65 = vector.multi_reduction <maximumf>, %64, %cst_36 [0] : vector<8x2xf32> to vector<2xf32>
      %66 = vector.shape_cast %65 : vector<2xf32> to vector<1x2xf32>
      %67 = vector.broadcast %66 : vector<1x2xf32> to vector<8x2xf32>
      %68 = arith.subf %64, %67 : vector<8x2xf32>
      %69 = math.exp %68 : vector<8x2xf32>
      %cst_37 = arith.constant dense<0.000000e+00> : vector<2xf32>
      %70 = vector.multi_reduction <add>, %69, %cst_37 [0] : vector<8x2xf32> to vector<2xf32>
      %71 = vector.shape_cast %70 : vector<2xf32> to vector<1x2xf32>
      %72 = tpu.reciprocal %71 {approx = true} : vector<1x2xf32> -> vector<1x2xf32>
      %73 = vector.broadcast %72 : vector<1x2xf32> to vector<8x2xf32>
      %74 = arith.mulf %69, %73 : vector<8x2xf32>
      %c0_38 = arith.constant 0 : index
      %c0_39 = arith.constant 0 : index
      %75 = vector.load %arg6[%c0_38, %c0_39] : memref<8x2xf32, #tpu.memory_space<vmem>>, vector<8x2xf32>
      tpu.vector_store %arg6[%c0_38, %c0_39], %74 {strides = array<i32>} : memref<8x2xf32, #tpu.memory_space<vmem>>, vector<8x2xf32>,
    } else {
    }
    return
  }
  func.func @transform_0(%arg0: i32, %arg1: i32) -> (i32, i32) {
    %c0_i32 = arith.constant 0 : i32
    %c0_i32_0 = arith.constant 0 : i32
    return %arg0, %c0_i32 : i32, i32
  }
  func.func @transform_1(%arg0: i32, %arg1: i32) -> (i32, i32, i32) {
    %c0_i32 = arith.constant 0 : i32
    %c0_i32_0 = arith.constant 0 : i32
    return %arg1, %arg0, %c0_i32 : i32, i32, i32
  }
  func.func @transform_2(%arg0: i32, %arg1: i32) -> (i32, i32) {
    %c0_i32 = arith.constant 0 : i32
    %c0_i32_0 = arith.constant 0 : i32
    %c0_i32_1 = arith.constant 0 : i32
    return %c0_i32, %c0_i32_0 : i32, i32
  }
  func.func @transform_3(%arg0: i32, %arg1: i32) -> (i32, i32) {
    %c0_i32 = arith.constant 0 : i32
    %c0_i32_0 = arith.constant 0 : i32
    %c0_i32_1 = arith.constant 0 : i32
    return %c0_i32, %c0_i32_0 : i32, i32
  }
  func.func @transform_4(%arg0: i32, %arg1: i32) -> (i32, i32) {
    %c0_i32 = arith.constant 0 : i32
    %c0_i32_0 = arith.constant 0 : i32
    return %c0_i32, %arg0 : i32, i32
  }
}

</mosaic_0001>

<bundles_post_ra>
// kernel: tpu_custom_call.1
= control target key start
LH: loop header
LB: loop body
LE: loop exit
PB: predicated region body
PF: predicated region fallthrough
CT: control target
= control target key end

     0   :  { %9 = vsyncpa [#allocation3], 0  ;;  %s1381_s0 = inlined_call_operand.hbm [shape: f32[2,32], index: 0, kind: input, shape index: {}]   ;;  %s1382_s1 = inlined_call_operand.hbm [shape: f32[8,2,32], index: 1, kind: input, shape index: {}]   ;;  %s1383_s2 = inlined_call_operand.hbm [shape: f32[32,32], index: 2, kind: input, shape index: {}]   ;;  %s1384_s3 = inlined_call_operand.vmem [shape: f32[1,32], index: 3, kind: input, shape index: {}]   ;;  %s1385_s4 = inlined_call_operand.vmem [shape: f32[8,2], index: 4, kind: output, shape index: {}]  }
   0x1   :  { %10 = vsyncpa [#allocation5], 0 }
   0x2   :  { %12 = vsyncpa [#allocation5 + $0x1], 0  ;;  %s1158_s15 = smov 0   ;;  %s1160_s16 = smov 0  }
   0x3   :  { %s1162_s17 = smov 0   ;;  %s1164_s18 = smov 0  }
   0x4   :  { %s1166_s19 = smov 0   ;;  %s1168_s20 = smov 0  }
   0x5 LB: > { %s770_s21 = sadd.s32 4294967295, %s1121_s20   ;;  %p72_p0 = scmp.ne.s32.totalorder %s1109_s17, %s1105_s16  ;;  %s1121_s20 = sphi %s1168_s20, %s18_s20   ;;  %s1117_s19 = sphi %s1166_s19, %s1404_s19   ;;  %s1113_s18 = sphi %s1164_s18, %s1403_s18   ;;  %s1109_s17 = sphi %s1162_s17, %s1402_s17   ;;  %s1105_s16 = sphi %s1160_s16, %s1401_s16   ;;  %s1101_s15 = sphi %s1158_s15, %s1400_s15  }
   0x6   : > { %p73_p1 = scmp.eq.s32.totalorder %s1121_s20, 0  ;;  %p78_p2 = scmp.ne.s32.totalorder %s1105_s16, %s1101_s15 }
   0x7   : > { %p1193_p3 = scmp.eq.s32.totalorder %s770_s21, 0  ;;  %p771_p4 = scmp.ge.s32.totalorder %s1121_s20, 1 }
   0x8   : > { %p74_p5 = por %p73_p1, %p72_p0  ;;  %p157_p6 = scmp.lt.s32.totalorder %s1121_s20, 3 }
   0x9   : > { %s1391_s22 = scalar_select %p1193_p3, 1, 0 }
   0xa   : > { %p1201_p7 = por %p1193_p3, %p78_p2  ;;  %p1205_p8 = pnand %p771_p4, %p157_p6 }
   0xb   : > { %s1123_s25 = smov [#allocation6]   ;;  %p913_p11 = scmp.lt.s32.totalorder %s1121_s20, 2 }
   0xc   : > { %s1392_s23 = scalar_select %p1201_p7, 1, 0 }
   0xd   : > { %s1393_s24 = scalar_select %p1205_p8, 1, 0 }
   0xe   : > { %s182_s26 = sshll.u32 %s1123_s25, 4  ;;  %p900_p9 = pneg %p1205_p8  ;;  %s183_s26 = int_to_ptr.vmem [resolvable:$true] %s182_s26 }
   0xf   : > { %p1218_p12 = pnand %p913_p11, %p74_p5  ;;  %s977_s5 = scalar_lea.hbm %s1383_s2, 512 }
  0x10   : > { %p1213_p10 = pnand %p900_p9, %p1193_p3  ;;  %p978_p13 = scmp.ne.s32.totalorder %s1383_s2, %s977_s5 }
  0x11   : > { %s1395_s28 = scalar_select %p1218_p12, 1, 0 }
  0x12   : > { %p979_p0 = pneg %p1213_p10  ;;  %p984_p4 = scmp.lt.u32.totalorder %s977_s5, %s1383_s2 }
  0x14   : > { %p980_p1 = pnand %p979_p0, %p978_p13 }
  0x16   : > { %p981_p2 = pneg %p980_p1 }
  0x18   : > { %p986_p5 = pnand %p984_p4, %p981_p2 }
  0x1a   : > { %989 = shalt.err (!%p986_p5)
}
  0x1b   : > { %s990_s10 = scalar_lea.vmem %s183_s26, 512  ;;  %p998_p7 = scmp.lt.s32.totalorder %s183_s26, %s183_s26 }
  0x1c   : > { %p991_p6 = scmp.ne.s32.totalorder %s183_s26, %s990_s10  ;;  %p999_p3 = scmp.lt.s32.totalorder %s990_s10, %s990_s10 }
  0x1e   : > { %p993_p9 = pnand %p991_p6, %p979_p0  ;;  %p1000_p8 = por %p999_p3, %p998_p7 }
  0x20   : > { %p994_p11 = pneg %p993_p9 }
  0x22   : > { %p1001_p12 = pnand %p1000_p8, %p994_p11 }
  0x24   : > { %1004 = shalt.err (!%p1001_p12)
}
  0x25   : > { %s1124_s11 = smov 128   ;;  %s1125_s12 = smov 8  }
  0x26   : > { %906 = dma.hbm_to_vmem [thread:$0]  (!%p1213_p10), %s1383_s2, 512, %s183_s26, [#allocation5], %s1124_s11, %s1124_s11, %s1125_s12  }
  0x27   : > { %s1126_s15 = smov [#allocation2]   ;;  %s1005_s5 = scalar_lea.hbm %s1381_s0, 32 }
  0x28   : > { %s172_s25 = sshll.u32 %s1126_s15, 4  ;;  %p1006_p3 = scmp.ne.s32.totalorder %s1381_s0, %s1005_s5  ;;  %s173_s25 = int_to_ptr.vmem [resolvable:$true] %s172_s25 }
  0x29   : > { %p1012_p12 = scmp.lt.u32.totalorder %s1005_s5, %s1381_s0 }
  0x2a   : > { %p1008_p7 = pnand %p1006_p3, %p979_p0 }
  0x2c   : > { %p1009_p8 = pneg %p1008_p7 }
  0x2e   : > { %p1014_p13 = pnand %p1012_p12, %p1009_p8 }
  0x30   : > { %1017 = shalt.err (!%p1014_p13)
}
  0x31   : > { %s1018_s26 = scalar_lea.vmem %s173_s25, 32  ;;  %p1026_p5 = scmp.lt.s32.totalorder %s173_s25, %s173_s25 }
  0x32   : > { %p1019_p1 = scmp.ne.s32.totalorder %s173_s25, %s1018_s26  ;;  %p1027_p6 = scmp.lt.s32.totalorder %s1018_s26, %s1018_s26 }
  0x34   : > { %p1021_p2 = pnand %p1019_p1, %p979_p0  ;;  %p1028_p9 = por %p1027_p6, %p1026_p5 }
  0x36   : > { %p1022_p4 = pneg %p1021_p2 }
  0x38   : > { %p1029_p11 = pnand %p1028_p9, %p1022_p4 }
  0x3a   : > { %1032 = shalt.err (!%p1029_p11)
}
  0x3b   : > { %903 = dma.hbm_to_vmem [thread:$0]  (!%p1213_p10), %s1381_s0, 32, %s173_s25, [#allocation3]  }
  0x3c   : > { %s27_s12 = sadd.s32 1, %s1117_s19  ;;  %s65_s13 = sadd.s32 1, %s1109_s17 }
  0x3d   : > { %p28_p0 = scmp.ge.s32.totalorder %s27_s12, 2  ;;  %s199_s14 = sand.u32 1, %s1121_s20  }
  0x3e   : > { %s201_s15 = sand.u32 1, %s1109_s17   ;;  %s801_s29 = sshll.u32 %s1117_s19, 7 }
  0x3f   : > { %s1406_s12 = smov (%p28_p0, %s27_s12), 0  ;;  %s775_s27 = sshll.u32 %s201_s15, 3 }
  0x40   : > { %s60_s30 = ssub.s32 %s1117_s19, %s1406_s12  ;;  %s1276_s7 = scalar_lea.hbm %s1382_s1, %s801_s29 }
  0x41   : > { %p63_p3 = scmp.eq.s32.totalorder %s60_s30, 0  ;;  %s203_s25 = scalar_lea.vmem [#allocation4], %s775_s27 }
  0x42   : > { %s211_s8 = sshll.u32 %s203_s25, 4  ;;  %s1283_s26 = scalar_lea.sflag [#allocation5], %s199_s14  ;;  %s1281_s8 = int_to_ptr.vmem [resolvable:$true] %s211_s8 }
  0x43   : > { %s1279_s9 = scalar_select %p63_p3, %s1109_s17, %s65_s13  }
  0x44   : > { %s1033_s10 = scalar_lea.hbm %s1276_s7, 128  ;;  %p1396_p7 = scmp.ne.s32.totalorder %s1395_s28, 0 }
  0x45   : > { %p1034_p10 = scmp.ne.s32.totalorder %s1276_s7, %s1033_s10  ;;  %s1038_s29 = scalar_lea.hbm %s1382_s1, 256 }
  0x46   : > { %p1035_p8 = pneg %p1396_p7  ;;  %p1039_p1 = scmp.lt.u32.totalorder %s1276_s7, %s1382_s1 }
  0x47   : > { %p1040_p2 = scmp.lt.u32.totalorder %s1038_s29, %s1033_s10  ;;  %p1042_p5 = scmp.lt.u32.totalorder %s1033_s10, %s1276_s7 }
  0x48   : > { %p1036_p12 = pnand %p1035_p8, %p1034_p10 }
  0x49   : > { %p1041_p4 = por %p1040_p2, %p1039_p1 }
  0x4a   : > { %p1037_p13 = pneg %p1036_p12 }
  0x4b   : > { %p1043_p6 = por %p1042_p5, %p1041_p4 }
  0x4d   : > { %p1044_p9 = pnand %p1043_p6, %p1037_p13 }
  0x4f   : > { %1047 = shalt.err (!%p1044_p9)
}
  0x50   : > { %s1048_s13 = scalar_lea.vmem %s1281_s8, 128  ;;  %s1127_s14 = smov [#allocation4]  }
  0x51   : > { %p1049_p11 = scmp.ne.s32.totalorder %s1281_s8, %s1048_s13  ;;  %s1053_s5 = sshll.u32 %s1127_s14, 4  ;;  %s1054_s5 = int_to_ptr.vmem [resolvable:$false] %s1053_s5 }
  0x52   : > { %s1055_s6 = scalar_lea.vmem %s1054_s5, 256  ;;  %p1056_p10 = scmp.lt.s32.totalorder %s1281_s8, %s1054_s5 }
  0x53   : > { %p1051_p0 = pnand %p1049_p11, %p1035_p8  ;;  %p1057_p12 = scmp.lt.s32.totalorder %s1055_s6, %s1048_s13 }
  0x55   : > { %p1052_p3 = pneg %p1051_p0  ;;  %p1058_p1 = por %p1057_p12, %p1056_p10 }
  0x57   : > { %p1059_p2 = pnand %p1058_p1, %p1052_p3 }
  0x59   : > { %1062 = shalt.err (!%p1059_p2)
}
  0x5a   : > { %s1128_s25 = smov 32   ;;  %s1129_s10 = smov 2  }
  0x5b   : > { %910 = dma.hbm_to_vmem [thread:$0]  (!%p1396_p7), %s1276_s7, 128, %s1281_s8, %s1283_s26, %s1128_s25, %s1128_s25, %s1129_s10  }
  0x5c   : > { %p1397_p8 = scmp.ne.s32.totalorder %s1393_s24, 0 }
  0x5d   : > { %p1398_p13 = scmp.ne.s32.totalorder (!%p1397_p8), %s1391_s22, 0 }
  0x5e   : > { %223 = sbr.rel (%p1397_p8) target bundleno = 558 (0x22e), region = 36 }
  0x65   : > { %1088 = dma.done.wait (%p1398_p13), [#allocation3], 32  }
  0x66   : > { %1090 = vsyncadd (%p1398_p13), [#allocation3], 4294967264  ;;  %s229_s11 = sand.u32 1, %s770_s21   ;;  %s231_s15 = sand.u32 1, %s1105_s16  }
  0x67   : > { %s780_s29 = sshll.u32 %s231_s15, 3  ;;  %s230_s27 = scalar_lea.sflag [#allocation5], %s229_s11 }
  0x68   : > { %s1320_s30 = scalar_lea.vmem [#allocation4], %s780_s29  ;;  %p1399_p7 = scmp.ne.s32.totalorder %s1392_s23, 0 }
  0x6a   : > { %1092 = dma.done.wait (%p1399_p7), %s230_s27, 128  }
  0x6b   : > { %1094 = vsyncadd (%p1399_p7), %s230_s27, 4294967168 }
  0x6c   : > { %1096 = dma.done.wait (%p1398_p13), [#allocation5], 512  }
  0x6d   : > { %1098 = vsyncadd (%p1398_p13), [#allocation5], 4294966784  ;;  %v1130_v0 = vmov 0.0|0.0   ;;  %vm1131_vm0 = vmmov 0   ;;  %v1132_v1 = vmov 0.0   ;;  %v266_v2 = vld [vmem:[#allocation6] sm:$0xff]  ;;  %v361_v38 = vlaneseq }
  0x6e   : > { %866 = vmatprep.subr.bf16.mxu0 %v1130_v0  ;;  %872 = vmatprep.subr.bf16.mxu1 %v1130_v0  ;;  %v267_v3 = vld [vmem:[#allocation6 + $0x8] sm:$0xff]  ;;  %v268_v4 = vld [vmem:[#allocation6 + $0x10] sm:$0xff]  ;;  %v269_v6 = vld [vmem:[#allocation6 + $0x18] sm:$0xff]  ;;  %vm279_vm1 = vcmask 261120   ;;  %vm355_vm2 = vcmask 254976   ;;  %s784_s23 = sshll.u32 %s1113_s18, 2 }
  0x6f   : > { %830 = vmatprep.mubr.msk.f32.mxu0 %vm1131_vm0, %v1132_v1  ;;  %841 = vmatprep.mubr.msk.f32.mxu1 %vm1131_vm0, %v1132_v1  ;;  %v867_v5 = vpack.c.bf16 %v267_v3, %v266_v2  ;;  %v870_v7 = vpack.c.bf16 %v269_v6, %v268_v4  ;;  %v278_v8 = vld [vmem:[%s1320_s30] sm:$0x3]  ;;  %v785_v9 = vld [vmem:[%s1320_s30 + $0x2] sm:$0x3]  ;;  %v789_v10 = vld [vmem:[%s1320_s30 + $0x4] sm:$0x3]  ;;  %s368_s7 = scalar_lea.vmem %s1385_s4, %s784_s23 }
  0x70   : > { %v793_v11 = vld [vmem:[%s1320_s30 + $0x6] sm:$0x3]  ;;  %v270_v12 = vld [vmem:[#allocation2] sm:$0x3]  ;;  %v782_v19 = vld [vmem:[%s1384_s3] ss:$0 sm:$0xff] }
  0x71   : > { %868 = vmatpush3.bf16.msra.mxu0 %v867_v5  ;;  %874 = vmatpush3.bf16.msra.mxu1 %v867_v5  ;;  %v362_v39 = vand.u32 127, %v361_v38  ;;  %v364_v40 = vshrl.u32 %v361_v38, 7  ;;  %vm369_vm3 = vcmask 8192   ;;  %p797_p4 = scmp.ne.s32.totalorder %s1113_s18, 1 }
  0x72   : > { %869 = vmatprep.subr.bf16.mxu0 %v1130_v0  ;;  %875 = vmatprep.subr.bf16.mxu1 %v1130_v0  ;;  %vm643_vm4 = vcmask (!%p797_p4), 15360  }
  0x73   : > { %v365_v41 = vsub.s32 %v362_v39, %v364_v40 }
  0x75   : > { %871 = vmatpush3.bf16.msra.mxu0 %v870_v7  ;;  %877 = vmatpush3.bf16.msra.mxu1 %v870_v7 }
  0x76   : > { %878 = vmatprep.subr.bf16.mxu0 %v1130_v0  ;;  %884 = vmatprep.subr.bf16.mxu1 %v1130_v0 }
  0x78   : > { %831 = vmatmul.mubr.msk.f32.vlgmr.msra.gmra.mrb[0].mxu0 %vm279_vm1, %v278_v8  ;;  %842 = vmatmul.mubr.msk.f32.vlgmr.msra.gmra.mrb[0].mxu1 %vm279_vm1, %v785_v9 }
  0x79   : > { %880 = vmatpush3.bf16.msra.mxu0 %v867_v5  ;;  %886 = vmatpush3.bf16.msra.mxu1 %v867_v5 }
  0x7a   : > { %881 = vmatprep.subr.bf16.mxu0 %v1130_v0  ;;  %852 = vmatprep.mubr.msk.f32.mxu0 %vm1131_vm0, %v1132_v1 }
  0x7b   : > { %887 = vmatprep.subr.bf16.mxu1 %v1130_v0  ;;  %863 = vmatprep.mubr.msk.f32.mxu1 %vm1131_vm0, %v1132_v1 }
  0x7d   : > { %883 = vmatpush3.bf16.msra.mxu0 %v870_v7  ;;  %889 = vmatpush3.bf16.msra.mxu1 %v870_v7 }
  0x80   : > { %853 = vmatmul.mubr.msk.f32.vlgmr.msra.gmra.mrb[2].mxu0 %vm279_vm1, %v789_v10  ;;  %864 = vmatmul.mubr.msk.f32.vlgmr.msra.gmra.mrb[2].mxu1 %vm279_vm1, %v793_v11 }
 0x14b   : > { %v349_v13 = vpop.f32.mrb[0].mxu0  ;;  %v442_v14 = vpop.f32.mrb[0].mxu1 }
 0x14c   : > { %v350_v15 = vadd.f32 %v349_v13, %v270_v12  ;;  %v832_v16 = vpop.f32.mrb[1].mxu0  ;;  %v443_v17 = vadd.f32 %v442_v14, %v270_v12  ;;  %v843_v18 = vpop.f32.mrb[1].mxu1 }
 0x14e   : > { %v353_v20 = vmax.f32 %v350_v15, 0.0  ;;  %v446_v21 = vmax.f32 %v443_v17, 0.0 }
 0x150   : > { %v354_v22 = vmul.f32 %v782_v19, %v353_v20  ;;  %v447_v23 = vmul.f32 %v782_v19, %v446_v21 }
 0x152   : > { %v356_v24 = vsel %vm355_vm2, %v354_v22, 0.0  ;;  %v448_v31 = vsel %vm355_vm2, %v447_v23, 0.0 }
 0x153   : > { %v531_v25 = vpop.f32.mrb[2].mxu0  ;;  %357 = vadd.xlane.f32.xlu0 %v356_v24  ;;  %v620_v26 = vpop.f32.mrb[2].mxu1 }
 0x154   : > { %v532_v27 = vadd.f32 %v531_v25, %v270_v12  ;;  %v854_v28 = vpop.f32.mrb[3].mxu0  ;;  %v621_v29 = vadd.f32 %v620_v26, %v270_v12  ;;  %v865_v30 = vpop.f32.mrb[3].mxu1 }
 0x156   : > { %v535_v32 = vmax.f32 %v532_v27, 0.0  ;;  %v624_v33 = vmax.f32 %v621_v29, 0.0 }
 0x157   : > { %449 = vadd.xlane.f32.xlu0 %v448_v31 }
 0x158   : > { %v536_v34 = vmul.f32 %v782_v19, %v535_v32  ;;  %v625_v35 = vmul.f32 %v782_v19, %v624_v33 }
 0x15a   : > { %v537_v36 = vsel %vm355_vm2, %v536_v34, 0.0  ;;  %v626_v37 = vsel %vm355_vm2, %v625_v35, 0.0 }
 0x15b   : > { %538 = vadd.xlane.f32.xlu1 %v537_v36 }
 0x15f   : > { %627 = vadd.xlane.f32.xlu1 %v626_v37 }
 0x1e0   : > { %v358_v42 = vpop.xlane.xlu0 %357 }
 0x1e1   : > { %v366_v43 = vrot.slane %v358_v42, %v365_v41 }
 0x1e3   : > { %370 = vst.msk [vmem:[%s368_s7] sm:$0x1] %vm369_vm3, %v366_v43 }
 0x1e4   : > { %v450_v44 = vpop.xlane.xlu0 %449 }
 0x1e5   : > { %v456_v45 = vrot.slane %v450_v44, %v365_v41 }
 0x1e7   : > { %788 = vst.msk [vmem:[%s368_s7 + $0x1] sm:$0x1] %vm369_vm3, %v456_v45 }
 0x1e8   : > { %v539_v46 = vpop.xlane.xlu1 %538 }
 0x1e9   : > { %v545_v47 = vrot.slane %v539_v46, %v365_v41  ;;  %641 = sbr.rel (%p797_p4) target bundleno = 558 (0x22e), region = 52 }
 0x1eb   : > { %792 = vst.msk [vmem:[%s368_s7 + $0x2] sm:$0x1] %vm369_vm3, %v545_v47 }
 0x1ec   : > { %v628_v48 = vpop.xlane.xlu1 %627 }
 0x1ed   : > { %v634_v49 = vrot.slane %v628_v48, %v365_v41 }
 0x1ef   : > { %796 = vst.msk [vmem:[%s368_s7 + $0x3] sm:$0x1] %vm369_vm3, %v634_v49 }
 0x1f6   : > { %v642_v50 = vld [vmem:[%s1385_s4] sm:$0xff] }
 0x1f7   : > { %v644_v51 = vsel %vm643_vm4, %v642_v50, -inf }
 0x1f8   : > { %v645_v52 = vrot.slane %v644_v51, 4 }
 0x1fa   : > { %v646_v53 = vmax.f32 %v644_v51, %v645_v52 }
 0x1fc   : > { %v647_v54 = vrot.slane %v646_v53, 2 }
 0x1fe   : > { %v648_v55 = vmax.f32 %v646_v53, %v647_v54 }
 0x200   : > { %v649_v56 = vrot.slane %v648_v55, 1 }
 0x202   : > { %v650_v57 = vmax.f32 %v648_v55, %v649_v56 }
 0x204   : > { %v651_v58 = vsub.f32 %v642_v50, %v650_v57 }
 0x206   : > { %v652_v59 = vmul.f32 1.442695, %v651_v58 }
 0x208   : > { %973 = vpow2.f32 %v652_v59 }
 0x212   : > { %v974_v60 = vpop.eup %973 }
 0x213   : > { %v654_v61 = vsel %vm643_vm4, %v974_v60, 0.0 }
 0x214   : > { %v655_v62 = vrot.slane %v654_v61, 4 }
 0x216   : > { %v656_v63 = vadd.f32 %v655_v62, %v654_v61 }
 0x218   : > { %v657_v0 = vrot.slane %v656_v63, 2 }
 0x21a   : > { %v658_v1 = vadd.f32 %v657_v0, %v656_v63 }
 0x21c   : > { %v659_v2 = vrot.slane %v658_v1, 1 }
 0x21e   : > { %v660_v3 = vadd.f32 %v659_v2, %v658_v1 }
 0x220   : > { %975 = vrcp.f32 %v660_v3 }
 0x22a   : > { %v976_v4 = vpop.eup %975 }
 0x22b   : > { %v662_v5 = vmul.f32 %v976_v4, %v974_v60 }
 0x22d   : > { %663 = vst.msk [vmem:[%s1385_s4] sm:$0xff] %vm643_vm4, %v662_v5 }
 0x22e PF: > { %s18_s20 = sadd.s32 1, %s1121_s20   ;;  %s1400_s15 = smov %s1105_s16 }
 0x22f   : > { %p15_p5 = scmp.ge.s32.totalorder %s18_s20, 4   ;;  %s1401_s16 = smov %s1109_s17 }
 0x230   : > { %s1402_s17 = smov %s1279_s9  ;;  %s1403_s18 = smov %s1117_s19 }
 0x231   : > { %s1404_s19 = smov %s1406_s12  ;;  %17 = sbr.rel (!%p15_p5) target bundleno = 5 (0x5), region = 97 }
 0x238   :  { %683 = vsyncpa [#allocation3], 1 }
 0x239   :  { %685 = vsyncpa [#allocation3 + $0x1], 1 }
 0x23a   :  { %686 = vsyncpa [#allocation5], 1 }
 0x23b   :  { %688 = vsyncpa [#allocation5 + $0x1], 1 }

</bundles_post_ra>
